<compile_context>
chip_gen: v5e
topology: v5e:2x2
jax: 0.10.0
libtpu: 0.0.40
codegen_flags: <defaults>
</compile_context>

<pallas_src>
import functools
import math

import jax
import jax.numpy as jnp
from jax.experimental import pallas as pl
from jax.experimental.pallas import tpu as pltpu


def _network_layer_kernel(mw_ref, x_ref, o_ref, *, d_in, inv_sqrt_n, non_linear):
    """One (d_out, tn) output tile: a = epilogue(W @ x_tile).

    mw_ref holds the full (d_out, d_in + 1) parameter; the last column is the
    bias.  a = relu(((W @ x) + b) * inv_sqrt_n) == relu(m_w @ cat([x, 1]) / sqrt(n)).
    """
    w_full = mw_ref[...]                 # (d_out, d_in + 1), resident across grid
    w = w_full[:, :d_in]                 # (d_out, d_in)   weight part
    b = w_full[:, d_in:]                 # (d_out, 1)      bias column

    acc = jnp.dot(w, x_ref[...], preferred_element_type=jnp.float32)

    # Fused epilogue: bias add + scale + (optional) ReLU in a single pass,
    # hidden under the MXU drain.
    a = (acc + b) * inv_sqrt_n
    if non_linear:
        a = jnp.maximum(a, 0.0)
    o_ref[...] = a.astype(o_ref.dtype)


def network_layer_forward(m_w, x, non_linear=True):
    """Pallas equivalent of NetworkLayer.forward.

    m_w: (D_out, D_in + 1)  (last column is the bias column)
    x  : (D_in, B)          (features, batch) -- same layout as the torch module
    returns (D_out, B) float32
    """
    d_out, n_inputs = m_w.shape
    d_in, batch = x.shape
    assert n_inputs == d_in + 1, "m_w.shape[1] must equal x.shape[0] + 1"

    inv_sqrt_n = 1.0 / math.sqrt(n_inputs)

    # 1-D grid over the batch axis only; weight/bias stay VMEM resident.
    # Small batches: one full-array block (no masking, grid = (1,)).
    # Large batches: lane-aligned 1024-wide tiles (ragged last tile is masked
    # by Mosaic), >= 2 tiles so both TensorCores get work on v7x.
    if batch <= 1024:
        tn = batch
    else:
        tn = 1024
    grid_n = pl.cdiv(batch, tn)

    kernel = functools.partial(_network_layer_kernel,
                               d_in=d_in,
                               inv_sqrt_n=inv_sqrt_n,
                               non_linear=non_linear)

    flops = 2 * d_out * n_inputs * batch
    bytes_accessed = 4 * (d_out * n_inputs + d_in * batch + d_out * batch)

    return pl.pallas_call(
        kernel,
        out_shape=jax.ShapeDtypeStruct((d_out, batch), jnp.float32),
        grid_spec=pltpu.PrefetchScalarGridSpec(
            num_scalar_prefetch=0,
            grid=(grid_n,),
            in_specs=[
                # Whole parameter, constant index_map -> DMA'd once, resident.
                pl.BlockSpec((d_out, n_inputs), lambda j: (0, 0),
                             memory_space=pltpu.MemorySpace.VMEM),
                # Streamed activation tile along the batch axis.
                pl.BlockSpec((d_in, tn), lambda j: (0, j),
                             memory_space=pltpu.MemorySpace.VMEM),
            ],
            out_specs=pl.BlockSpec((d_out, tn), lambda j: (0, j),
                                   memory_space=pltpu.MemorySpace.VMEM),
        ),
        compiler_params=pltpu.CompilerParams(
            dimension_semantics=("parallel",)),
        cost_estimate=pl.CostEstimate(flops=flops, transcendentals=0,
                                      bytes_accessed=bytes_accessed),
    )(m_w, x)


def _reference_forward(m_w, x, non_linear=True):
    n_inputs = m_w.shape[1]
    xb = jnp.concatenate([x, jnp.ones((1, x.shape[1]), dtype=x.dtype)], axis=0)
    xb = xb / math.sqrt(n_inputs)
    a = m_w @ xb
    if non_linear:
        a = jnp.maximum(a, 0.0)
    return a


if __name__ == "__main__":
    # Small shapes consistent with the module: D_in=32 input features, batch=8,
    # D_out=16 output units. n_inputs = D_in + 1 = 33 (bias included).
    d_in, d_out, batch = 32, 16, 8

    key = jax.random.PRNGKey(0)
    k_mw, k_vw, k_x = jax.random.split(key, 3)

    m_w = jax.random.normal(k_mw, (d_out, d_in + 1), dtype=jnp.float32) * 0.1
    v_w = jax.random.normal(k_vw, (d_out, d_in + 1), dtype=jnp.float32) * 0.01  # unused in forward
    x = jax.random.normal(k_x, (d_in, batch), dtype=jnp.float32)

    # non_linear=True path
    out = jax.block_until_ready(network_layer_forward(m_w, x, non_linear=True))
    ref = _reference_forward(m_w, x, non_linear=True)
    assert out.shape == (d_out, batch)
    assert jnp.allclose(out, ref, atol=1e-5, rtol=1e-5), "mismatch vs reference (relu)"

    # non_linear=False path
    out_lin = jax.block_until_ready(network_layer_forward(m_w, x, non_linear=False))
    ref_lin = _reference_forward(m_w, x, non_linear=False)
    assert jnp.allclose(out_lin, ref_lin, atol=1e-5, rtol=1e-5), "mismatch vs reference (linear)"

    print("KERNEL_OK")
</pallas_src>

<mosaic_0001>
module attributes {stable_mosaic.version = 11 : i64} {
  func.func @_network_layer_kernel(%arg0: i32, %arg1: memref<16x33xf32, #tpu.memory_space<vmem>>, %arg2: memref<32x8xf32, #tpu.memory_space<vmem>>, %arg3: memref<16x8xf32, #tpu.memory_space<vmem>>) attributes {dimension_semantics = [#tpu.dimension_semantics<parallel>], iteration_bounds = array<i64: 1>, scalar_prefetch = 0 : i64, scratch_operands = 0 : i64, tpu.core_type = #tpu.core_type<tc>, window_params = [{pipeline_mode = #tpu.pipeline_mode<synchronous>, transform_indices = @transform_0, window_bounds = array<i64: 16, 33>}, {transform_indices = @transform_1, window_bounds = array<i64: 32, 8>}, {transform_indices = @transform_2, window_bounds = array<i64: 16, 8>}]} {
    %c0 = arith.constant 0 : index
    %c0_0 = arith.constant 0 : index
    %0 = vector.load %arg1[%c0, %c0_0] : memref<16x33xf32, #tpu.memory_space<vmem>>, vector<16x33xf32>
    %1 = vector.extract_strided_slice %0 {offsets = [0, 0], sizes = [16, 32], strides = [1, 1]} : vector<16x33xf32> to vector<16x32xf32>
    %2 = vector.extract_strided_slice %0 {offsets = [0, 32], sizes = [16, 1], strides = [1, 1]} : vector<16x33xf32> to vector<16x1xf32>
    %c0_1 = arith.constant 0 : index
    %c0_2 = arith.constant 0 : index
    %3 = vector.load %arg2[%c0_1, %c0_2] : memref<32x8xf32, #tpu.memory_space<vmem>>, vector<32x8xf32>
    %cst = arith.constant dense<0.000000e+00> : vector<16x8xf32>
    %4 = tpu.matmul %1, %3, %cst {dimension_numbers = #tpu.dot_dimension_numbers<[1], [0], [0], [1], [0, 0, 1, 1], [], []>} : vector<16x32xf32>, vector<32x8xf32>, vector<16x8xf32> -> vector<16x8xf32>
    %5 = vector.broadcast %2 : vector<16x1xf32> to vector<16x8xf32>
    %6 = arith.addf %4, %5 : vector<16x8xf32>
    %cst_3 = arith.constant 0.17407766 : f32
    %7 = vector.broadcast %cst_3 : f32 to vector<16x8xf32>
    %8 = arith.mulf %6, %7 : vector<16x8xf32>
    %cst_4 = arith.constant 0.000000e+00 : f32
    %9 = vector.broadcast %cst_4 : f32 to vector<16x8xf32>
    %10 = arith.maximumf %8, %9 : vector<16x8xf32>
    %c0_5 = arith.constant 0 : index
    %c0_6 = arith.constant 0 : index
    %11 = vector.load %arg3[%c0_5, %c0_6] : memref<16x8xf32, #tpu.memory_space<vmem>>, vector<16x8xf32>
    tpu.vector_store %arg3[%c0_5, %c0_6], %10 {strides = array<i32>} : memref<16x8xf32, #tpu.memory_space<vmem>>, vector<16x8xf32>,
    return
  }
  func.func @transform_0(%arg0: i32) -> (i32, i32) {
    %c0_i32 = arith.constant 0 : i32
    %c0_i32_0 = arith.constant 0 : i32
    %c0_i32_1 = arith.constant 0 : i32
    return %c0_i32, %c0_i32_0 : i32, i32
  }
  func.func @transform_1(%arg0: i32) -> (i32, i32) {
    %c0_i32 = arith.constant 0 : i32
    %c0_i32_0 = arith.constant 0 : i32
    return %c0_i32, %arg0 : i32, i32
  }
  func.func @transform_2(%arg0: i32) -> (i32, i32) {
    %c0_i32 = arith.constant 0 : i32
    %c0_i32_0 = arith.constant 0 : i32
    return %c0_i32, %arg0 : i32, i32
  }
}

</mosaic_0001>

<bundles_post_ra>
// kernel: tpu_custom_call.1
= control target key start
LH: loop header
LB: loop body
LE: loop exit
PB: predicated region body
PF: predicated region fallthrough
CT: control target
= control target key end

     0   :  { %v74_v1 = vmov 32   ;;  %vm27_vm0 = vcmask 261120   ;;  %vm59_vm1 = vcmask 64512   ;;  %s114_s1 = inlined_call_operand.vmem [shape: f32[32,8], index: 1, kind: input, shape index: {}]   ;;  %s115_s0 = inlined_call_operand.vmem [shape: f32[16,33], index: 0, kind: input, shape index: {}]   ;;  %s116_s2 = inlined_call_operand.vmem [shape: f32[16,8], index: 2, kind: output, shape index: {}]  }
   0x1   :  { %v16_v0 = vld [vmem:[%s114_s1 + $0x18] sm:$0xff]  ;;  %73 = vset.pattern.permute.xlu0 %v74_v1  ;;  %v15_v2 = vld [vmem:[%s114_s1 + $0x10] sm:$0xff]  ;;  %v11_v3 = vld [vmem:[%s115_s0] sm:$0xff] }
   0x2   :  { %44 = vmatpush.msra.mxu0 %v16_v0  ;;  %68 = vmatpush.msra.mxu1 %v16_v0  ;;  %v14_v4 = vld [vmem:[%s114_s1 + $0x8] sm:$0xff]  ;;  %v13_v5 = vld [vmem:[%s114_s1] sm:$0xff] }
   0x3   :  { %19 = vperm.xlu0 %73, %v11_v3   ;;  %v12_v6 = vld [vmem:[%s115_s0 + $0x8] sm:$0xff] }
   0x4   :  { %45 = vmatpush.msra.mxu0 %v15_v2  ;;  %69 = vmatpush.msra.mxu1 %v15_v2 }
   0x6   :  { %46 = vmatpush.msra.mxu0 %v14_v4  ;;  %70 = vmatpush.msra.mxu1 %v14_v4 }
   0x8   :  { %47 = vmatpush.msra.mxu0 %v13_v5  ;;  %71 = vmatpush.msra.mxu1 %v13_v5 }
   0x9   :  { %66 = vmatmul.msk.f32.vlgmr.msra.gmra.mxu0 %vm27_vm0, %v11_v3  ;;  %67 = vmatmul.msk.f32.vlgmr.msra.gmra.mxu1 %vm27_vm0, %v12_v6 }
   0xb   :  { %24 = vperm.xlu0 %73, %v12_v6  }
  0x75   :  { %v20_v7 = vpop.permute.xlu0 %19 }
  0x7d   :  { %v25_v8 = vpop.permute.xlu0 %24 }
  0x86   :  { %v49_v9 = vpop.f32.mrf.mxu0  ;;  %v52_v10 = vpop.f32.mrf.mxu1 }
  0x87   :  { %v50_v11 = vadd.f32 %v49_v9, %v20_v7  ;;  %v53_v12 = vadd.f32 %v52_v10, %v25_v8 }
  0x89   :  { %v55_v13 = vmul.f32 0.17407766, %v50_v11  ;;  %v56_v14 = vmul.f32 0.17407766, %v53_v12 }
  0x8b   :  { %v57_v15 = vmax.f32 %v55_v13, 0.0  ;;  %v58_v16 = vmax.f32 %v56_v14, 0.0 }
  0x8d   :  { %60 = vst.msk [vmem:[%s116_s2] sm:$0xff] %vm59_vm1, %v57_v15 }
  0x8e   :  { %61 = vst.msk [vmem:[%s116_s2 + $0x8] sm:$0xff] %vm59_vm1, %v58_v16 }

</bundles_post_ra>
